<compile_context>
chip_gen: v7x
topology: tpu7x:2x2x1
jax: 0.10.0
libtpu: 0.0.40
codegen_flags: <defaults>
</compile_context>

<pallas_src>
import jax
import jax.numpy as jnp
from jax.experimental import pallas as pl
from jax.experimental.pallas import tpu as pltpu


def time_mixing_kernel(x_ref, w1_ref, b1_ref, w2_ref, b2_ref, g_ref, beta_ref, o_ref):
    # x_ref / o_ref : [S, TF] lane-dense block (time on sublanes, columns on lanes)
    # w1_ref: [H, S]   b1_ref: [H, 1]        (nn.Linear(seq_len -> hidden))
    # w2_ref: [S, H]   b2_ref: [S, 1]        (nn.Linear(hidden -> seq_len))
    # g_ref / beta_ref: [S, 1]               (nn.LayerNorm(seq_len))
    x = x_ref[...]                                          # [S, TF], native dtype

    # Time-mixing MLP: both contractions are standard W @ x matmuls on the MXU,
    # f32-accumulated, with no in-loop weight or activation transposes.
    h = jnp.dot(w1_ref[...], x, preferred_element_type=jnp.float32)       # [H, TF]
    h = jnp.maximum(h + b1_ref[...], 0.0)
    z = jnp.dot(w2_ref[...], h.astype(w2_ref.dtype),
                preferred_element_type=jnp.float32)                       # [S, TF]

    # Residual + LayerNorm over the time axis (sublanes), fused single pass, f32.
    mixed = x.astype(jnp.float32) + z + b2_ref[...]
    inv_s = 1.0 / mixed.shape[0]                                          # no divides
    mean = jnp.sum(mixed, axis=0, keepdims=True) * inv_s                  # [1, TF]
    ex2 = jnp.sum(mixed * mixed, axis=0, keepdims=True) * inv_s           # [1, TF]
    var = ex2 - mean * mean
    normed = (mixed - mean) * jax.lax.rsqrt(var + 1e-5)
    o_ref[...] = (normed * g_ref[...] + beta_ref[...]).astype(o_ref.dtype)


def time_mixing(x, w1, b1, w2, b2, gamma, beta, *, max_tf=2048):
    """TimeMixing forward (eval mode).

    Args:
      x:     [B, S, F] activations.
      w1:    [H, S]  weight of nn.Linear(seq_len, hidden_size)  (PyTorch [out,in])
      b1:    [H]
      w2:    [S, H]  weight of nn.Linear(hidden_size, seq_len)
      b2:    [S]
      gamma: [S]     LayerNorm(seq_len) weight
      beta:  [S]     LayerNorm(seq_len) bias
    Returns: [B, S, F]
    """
    B, S, F = x.shape
    H = w1.shape[0]

    b1c = b1.reshape(H, 1).astype(jnp.float32)
    b2c = b2.reshape(S, 1).astype(jnp.float32)
    g_c = gamma.reshape(S, 1).astype(jnp.float32)
    be_c = beta.reshape(S, 1).astype(jnp.float32)

    # ---- layout: put the independent (batch, feature) columns on the lanes ----
    fold = (F % 128 != 0) or (B > 1 and S % 8 != 0)
    if fold:
        # One wrapper transpose so small / ragged F still gives lane-dense,
        # unmasked stores and a full MXU N dimension (biggest measured lever).
        x_in = jnp.transpose(x, (1, 0, 2)).reshape(S, B * F)       # [S, B*F]
        n = B * F
    else:
        x_in = x.reshape(B * S, F)                                 # free reshape
        n = F
    n_pad = pl.cdiv(n, 128) * 128                                  # waste <= 127 cols
    if n_pad != n:
        x_in = jnp.pad(x_in, ((0, 0), (0, n_pad - n)))

    # ---- generation-aware lane tile + VMEM budget ----
    itemsize = jnp.dtype(x.dtype).itemsize
    w_itemsize = jnp.dtype(w1.dtype).itemsize
    try:
        vmem_phys = pltpu.get_tpu_info().vmem_capacity_bytes       # 64 MiB v7x, 128 MiB v5e/v6e
    except Exception:
        vmem_phys = 64 << 20
    vmem_cap = int(min(vmem_phys * 3 // 4, 100 << 20))

    def vmem_est(tf_):
        act = 2 * S * tf_ * itemsize                     # double-buffered x blocks
        outb = 2 * S * tf_ * itemsize                    # double-buffered out blocks
        tmp = (H + 5 * S) * tf_ * 4                      # f32 temporaries (h, z, mixed, ...)
        wts = 2 * S * H * w_itemsize + (H + 3 * S) * 128 * 4   # single-buffered invariants
        return act + outb + tmp + wts + (2 << 20)

    m = n_pad // 128
    tf = 128
    for d in range(1, m + 1):                            # largest 128-multiple divisor
        if m % d == 0:
            cand = d * 128
            if cand <= max_tf and vmem_est(cand) <= vmem_cap:
                tf = cand
    n_tiles = n_pad // tf
    batch_grid = 1 if fold else B
    if batch_grid * n_tiles == 1 and tf >= 256:          # give both v7x TCs a shard
        tf //= 2
        n_tiles = 2
    vmem_limit = int(min(max(vmem_est(tf), 16 << 20), vmem_cap))

    # ---- grid & specs ----
    if fold:
        grid = (n_tiles,)
        dims = ("parallel",)
        x_index = lambda f: (0, f)
        w_index = lambda f: (0, 0)
    else:
        grid = (batch_grid, n_tiles)
        dims = ("parallel", "parallel")
        x_index = lambda b, f: (b, f)
        w_index = lambda b, f: (0, 0)

    total_cols = n_pad if fold else B * n_pad
    cost = pl.CostEstimate(
        flops=int(4 * total_cols * S * H + 12 * total_cols * S),
        transcendentals=int(total_cols),
        bytes_accessed=int(2 * total_cols * S * itemsize
                           + 2 * S * H * w_itemsize + (H + 3 * S) * 4),
    )

    def build(single_buffer_invariants):
        def inv_spec(shape):
            if single_buffer_invariants:
                return pl.BlockSpec(shape, w_index, pipeline_mode=pl.Buffered(1))
            return pl.BlockSpec(shape, w_index)
        return pl.pallas_call(
            time_mixing_kernel,
            out_shape=jax.ShapeDtypeStruct(x_in.shape, x.dtype),
            grid=grid,
            in_specs=[
                pl.BlockSpec((S, tf), x_index),          # activation block
                inv_spec((H, S)),                        # W1
                inv_spec((H, 1)),                        # b1
                inv_spec((S, H)),                        # W2
                inv_spec((S, 1)),                        # b2
                inv_spec((S, 1)),                        # gamma
                inv_spec((S, 1)),                        # beta
            ],
            out_specs=pl.BlockSpec((S, tf), x_index),
            compiler_params=pltpu.CompilerParams(
                dimension_semantics=dims, vmem_limit_bytes=vmem_limit),
            cost_estimate=cost,
        )

    args = (x_in, w1, b1c, w2, b2c, g_c, be_c)
    try:
        out = build(True)(*args)
    except Exception:
        # Fallback for environments without BlockSpec(pipeline_mode=pl.Buffered(1)).
        out = build(False)(*args)

    if fold:
        if n_pad != n:
            out = out[:, :n]
        out = jnp.transpose(out.reshape(S, B, F), (1, 0, 2))
    else:
        out = out.reshape(B, S, F)
    return out


def reference_time_mixing(x, w1, b1, w2, b2, gamma, beta):
    """Pure-JAX reference mirroring the PyTorch TimeMixing module (eval mode)."""
    x_t = jnp.transpose(x, (0, 2, 1))                  # [B, F, S]
    h = jnp.maximum(x_t @ w1.T + b1, 0.0)              # [B, F, H]
    z = h @ w2.T + b2                                  # [B, F, S]
    mixed = x_t + z
    mean = jnp.mean(mixed, axis=-1, keepdims=True)
    var = jnp.mean((mixed - mean) ** 2, axis=-1, keepdims=True)
    normed = (mixed - mean) / jnp.sqrt(var + 1e-5)
    out = normed * gamma + beta
    return jnp.transpose(out, (0, 2, 1))               # [B, S, F]


if __name__ == "__main__":
    key = jax.random.PRNGKey(0)

    def make_params(S, H, k):
        k1, k2, k3, k4 = jax.random.split(k, 4)
        w1 = jax.random.normal(k1, (H, S), jnp.float32) * (1.0 / jnp.sqrt(S))
        b1 = jax.random.normal(k2, (H,), jnp.float32) * 0.1
        w2 = jax.random.normal(k3, (S, H), jnp.float32) * (1.0 / jnp.sqrt(H))
        b2 = jax.random.normal(k4, (S,), jnp.float32) * 0.1
        gamma = jnp.ones((S,), jnp.float32)             # nn.LayerNorm default init
        beta = jnp.zeros((S,), jnp.float32)
        return w1, b1, w2, b2, gamma, beta

    # Case 1: tiny F (forces the batch-folded, lane-dense layout).
    # Shapes follow the module's forward: [batch, seq_len, feature_dim].
    B, S, F, H = 2, 16, 8, 32
    kx, kp = jax.random.split(key)
    x = jax.random.normal(kx, (B, S, F), jnp.float32)
    params = make_params(S, H, kp)
    out = jax.block_until_ready(time_mixing(x, *params))
    ref = reference_time_mixing(x, *params)
    assert out.shape == (B, S, F)
    assert jnp.allclose(out, ref, atol=1e-5, rtol=1e-5), "fold-path mismatch vs reference"

    # Case 2: F a multiple of 128 (exercises the native, transpose-free layout).
    B2, S2, F2, H2 = 2, 16, 128, 32
    kx2, kp2 = jax.random.split(kp)
    xb = jax.random.normal(kx2, (B2, S2, F2), jnp.float32)
    params2 = make_params(S2, H2, kp2)
    out2 = jax.block_until_ready(time_mixing(xb, *params2))
    ref2 = reference_time_mixing(xb, *params2)
    assert out2.shape == (B2, S2, F2)
    assert jnp.allclose(out2, ref2, atol=1e-5, rtol=1e-5), "native-path mismatch vs reference"

    print("KERNEL_OK")
</pallas_src>

<mosaic_0001>
module attributes {stable_mosaic.version = 11 : i64} {
  func.func @time_mixing_kernel(%arg0: i32, %arg1: memref<16x128xf32, #tpu.memory_space<vmem>>, %arg2: memref<32x16xf32, #tpu.memory_space<vmem>>, %arg3: memref<32x1xf32, #tpu.memory_space<vmem>>, %arg4: memref<16x32xf32, #tpu.memory_space<vmem>>, %arg5: memref<16x1xf32, #tpu.memory_space<vmem>>, %arg6: memref<16x1xf32, #tpu.memory_space<vmem>>, %arg7: memref<16x1xf32, #tpu.memory_space<vmem>>, %arg8: memref<16x128xf32, #tpu.memory_space<vmem>>) attributes {dimension_semantics = [#tpu.dimension_semantics<parallel>], iteration_bounds = array<i64: 1>, scalar_prefetch = 0 : i64, scratch_operands = 0 : i64, tpu.core_type = #tpu.core_type<tc>, window_params = [{transform_indices = @transform_0, window_bounds = array<i64: 16, 128>}, {pipeline_mode = #tpu.pipeline_mode<synchronous>, transform_indices = @transform_1, window_bounds = array<i64: 32, 16>}, {pipeline_mode = #tpu.pipeline_mode<synchronous>, transform_indices = @transform_2, window_bounds = array<i64: 32, 1>}, {pipeline_mode = #tpu.pipeline_mode<synchronous>, transform_indices = @transform_3, window_bounds = array<i64: 16, 32>}, {pipeline_mode = #tpu.pipeline_mode<synchronous>, transform_indices = @transform_4, window_bounds = array<i64: 16, 1>}, {pipeline_mode = #tpu.pipeline_mode<synchronous>, transform_indices = @transform_5, window_bounds = array<i64: 16, 1>}, {pipeline_mode = #tpu.pipeline_mode<synchronous>, transform_indices = @transform_6, window_bounds = array<i64: 16, 1>}, {transform_indices = @transform_7, window_bounds = array<i64: 16, 128>}]} {
    %c0 = arith.constant 0 : index
    %c0_0 = arith.constant 0 : index
    %0 = vector.load %arg1[%c0, %c0_0] : memref<16x128xf32, #tpu.memory_space<vmem>>, vector<16x128xf32>
    %c0_1 = arith.constant 0 : index
    %c0_2 = arith.constant 0 : index
    %1 = vector.load %arg2[%c0_1, %c0_2] : memref<32x16xf32, #tpu.memory_space<vmem>>, vector<32x16xf32>
    %cst = arith.constant dense<0.000000e+00> : vector<32x128xf32>
    %2 = tpu.matmul %1, %0, %cst {dimension_numbers = #tpu.dot_dimension_numbers<[1], [0], [0], [1], [0, 0, 1, 1], [], []>} : vector<32x16xf32>, vector<16x128xf32>, vector<32x128xf32> -> vector<32x128xf32>
    %c0_3 = arith.constant 0 : index
    %c0_4 = arith.constant 0 : index
    %3 = vector.load %arg3[%c0_3, %c0_4] : memref<32x1xf32, #tpu.memory_space<vmem>>, vector<32x1xf32>
    %4 = vector.broadcast %3 : vector<32x1xf32> to vector<32x128xf32>
    %5 = arith.addf %2, %4 : vector<32x128xf32>
    %cst_5 = arith.constant 0.000000e+00 : f32
    %6 = vector.broadcast %cst_5 : f32 to vector<32x128xf32>
    %7 = arith.maximumf %5, %6 : vector<32x128xf32>
    %c0_6 = arith.constant 0 : index
    %c0_7 = arith.constant 0 : index
    %8 = vector.load %arg4[%c0_6, %c0_7] : memref<16x32xf32, #tpu.memory_space<vmem>>, vector<16x32xf32>
    %cst_8 = arith.constant dense<0.000000e+00> : vector<16x128xf32>
    %9 = tpu.matmul %8, %7, %cst_8 {dimension_numbers = #tpu.dot_dimension_numbers<[1], [0], [0], [1], [0, 0, 1, 1], [], []>} : vector<16x32xf32>, vector<32x128xf32>, vector<16x128xf32> -> vector<16x128xf32>
    %10 = arith.addf %0, %9 : vector<16x128xf32>
    %c0_9 = arith.constant 0 : index
    %c0_10 = arith.constant 0 : index
    %11 = vector.load %arg5[%c0_9, %c0_10] : memref<16x1xf32, #tpu.memory_space<vmem>>, vector<16x1xf32>
    %12 = vector.broadcast %11 : vector<16x1xf32> to vector<16x128xf32>
    %13 = arith.addf %10, %12 : vector<16x128xf32>
    %cst_11 = arith.constant dense<0.000000e+00> : vector<128xf32>
    %14 = vector.multi_reduction <add>, %13, %cst_11 [0] : vector<16x128xf32> to vector<128xf32>
    %15 = vector.shape_cast %14 : vector<128xf32> to vector<1x128xf32>
    %cst_12 = arith.constant 6.250000e-02 : f32
    %16 = vector.broadcast %cst_12 : f32 to vector<1x128xf32>
    %17 = arith.mulf %15, %16 : vector<1x128xf32>
    %18 = arith.mulf %13, %13 : vector<16x128xf32>
    %cst_13 = arith.constant dense<0.000000e+00> : vector<128xf32>
    %19 = vector.multi_reduction <add>, %18, %cst_13 [0] : vector<16x128xf32> to vector<128xf32>
    %20 = vector.shape_cast %19 : vector<128xf32> to vector<1x128xf32>
    %cst_14 = arith.constant 6.250000e-02 : f32
    %21 = vector.broadcast %cst_14 : f32 to vector<1x128xf32>
    %22 = arith.mulf %20, %21 : vector<1x128xf32>
    %23 = arith.mulf %17, %17 : vector<1x128xf32>
    %24 = arith.subf %22, %23 : vector<1x128xf32>
    %25 = vector.broadcast %17 : vector<1x128xf32> to vector<16x128xf32>
    %26 = arith.subf %13, %25 : vector<16x128xf32>
    %cst_15 = arith.constant 9.99999974E-6 : f32
    %27 = vector.broadcast %cst_15 : f32 to vector<1x128xf32>
    %28 = arith.addf %24, %27 : vector<1x128xf32>
    %29 = math.rsqrt %28 : vector<1x128xf32>
    %30 = vector.broadcast %29 : vector<1x128xf32> to vector<16x128xf32>
    %31 = arith.mulf %26, %30 : vector<16x128xf32>
    %c0_16 = arith.constant 0 : index
    %c0_17 = arith.constant 0 : index
    %32 = vector.load %arg6[%c0_16, %c0_17] : memref<16x1xf32, #tpu.memory_space<vmem>>, vector<16x1xf32>
    %33 = vector.broadcast %32 : vector<16x1xf32> to vector<16x128xf32>
    %34 = arith.mulf %31, %33 : vector<16x128xf32>
    %c0_18 = arith.constant 0 : index
    %c0_19 = arith.constant 0 : index
    %35 = vector.load %arg7[%c0_18, %c0_19] : memref<16x1xf32, #tpu.memory_space<vmem>>, vector<16x1xf32>
    %36 = vector.broadcast %35 : vector<16x1xf32> to vector<16x128xf32>
    %37 = arith.addf %34, %36 : vector<16x128xf32>
    %c0_20 = arith.constant 0 : index
    %c0_21 = arith.constant 0 : index
    %38 = vector.load %arg8[%c0_20, %c0_21] : memref<16x128xf32, #tpu.memory_space<vmem>>, vector<16x128xf32>
    tpu.vector_store %arg8[%c0_20, %c0_21], %37 {strides = array<i32>} : memref<16x128xf32, #tpu.memory_space<vmem>>, vector<16x128xf32>,
    return
  }
  func.func @transform_0(%arg0: i32) -> (i32, i32) {
    %c0_i32 = arith.constant 0 : i32
    %c0_i32_0 = arith.constant 0 : i32
    return %c0_i32, %arg0 : i32, i32
  }
  func.func @transform_1(%arg0: i32) -> (i32, i32) {
    %c0_i32 = arith.constant 0 : i32
    %c0_i32_0 = arith.constant 0 : i32
    %c0_i32_1 = arith.constant 0 : i32
    return %c0_i32, %c0_i32_0 : i32, i32
  }
  func.func @transform_2(%arg0: i32) -> (i32, i32) {
    %c0_i32 = arith.constant 0 : i32
    %c0_i32_0 = arith.constant 0 : i32
    %c0_i32_1 = arith.constant 0 : i32
    return %c0_i32, %c0_i32_0 : i32, i32
  }
  func.func @transform_3(%arg0: i32) -> (i32, i32) {
    %c0_i32 = arith.constant 0 : i32
    %c0_i32_0 = arith.constant 0 : i32
    %c0_i32_1 = arith.constant 0 : i32
    return %c0_i32, %c0_i32_0 : i32, i32
  }
  func.func @transform_4(%arg0: i32) -> (i32, i32) {
    %c0_i32 = arith.constant 0 : i32
    %c0_i32_0 = arith.constant 0 : i32
    %c0_i32_1 = arith.constant 0 : i32
    return %c0_i32, %c0_i32_0 : i32, i32
  }
  func.func @transform_5(%arg0: i32) -> (i32, i32) {
    %c0_i32 = arith.constant 0 : i32
    %c0_i32_0 = arith.constant 0 : i32
    %c0_i32_1 = arith.constant 0 : i32
    return %c0_i32, %c0_i32_0 : i32, i32
  }
  func.func @transform_6(%arg0: i32) -> (i32, i32) {
    %c0_i32 = arith.constant 0 : i32
    %c0_i32_0 = arith.constant 0 : i32
    %c0_i32_1 = arith.constant 0 : i32
    return %c0_i32, %c0_i32_0 : i32, i32
  }
  func.func @transform_7(%arg0: i32) -> (i32, i32) {
    %c0_i32 = arith.constant 0 : i32
    %c0_i32_0 = arith.constant 0 : i32
    return %c0_i32, %arg0 : i32, i32
  }
}

module attributes {stable_mosaic.version = 11 : i64} {
  func.func @time_mixing_kernel(%arg0: i32, %arg1: memref<16x128xf32, #tpu.memory_space<vmem>>, %arg2: memref<32x16xf32, #tpu.memory_space<vmem>>, %arg3: memref<32x1xf32, #tpu.memory_space<vmem>>, %arg4: memref<16x32xf32, #tpu.memory_space<vmem>>, %arg5: memref<16x1xf32, #tpu.memory_space<vmem>>, %arg6: memref<16x1xf32, #tpu.memory_space<vmem>>, %arg7: memref<16x1xf32, #tpu.memory_space<vmem>>, %arg8: memref<16x128xf32, #tpu.memory_space<vmem>>) attributes {dimension_semantics = [#tpu.dimension_semantics<parallel>], iteration_bounds = array<i64: 1>, scalar_prefetch = 0 : i64, scratch_operands = 0 : i64, tpu.core_type = #tpu.core_type<tc>, window_params = [{transform_indices = @transform_0, window_bounds = array<i64: 16, 128>}, {pipeline_mode = #tpu.pipeline_mode<synchronous>, transform_indices = @transform_1, window_bounds = array<i64: 32, 16>}, {pipeline_mode = #tpu.pipeline_mode<synchronous>, transform_indices = @transform_2, window_bounds = array<i64: 32, 1>}, {pipeline_mode = #tpu.pipeline_mode<synchronous>, transform_indices = @transform_3, window_bounds = array<i64: 16, 32>}, {pipeline_mode = #tpu.pipeline_mode<synchronous>, transform_indices = @transform_4, window_bounds = array<i64: 16, 1>}, {pipeline_mode = #tpu.pipeline_mode<synchronous>, transform_indices = @transform_5, window_bounds = array<i64: 16, 1>}, {pipeline_mode = #tpu.pipeline_mode<synchronous>, transform_indices = @transform_6, window_bounds = array<i64: 16, 1>}, {transform_indices = @transform_7, window_bounds = array<i64: 16, 128>}]} {
    %c0 = arith.constant 0 : index
    %c0_0 = arith.constant 0 : index
    %0 = vector.load %arg1[%c0, %c0_0] : memref<16x128xf32, #tpu.memory_space<vmem>>, vector<16x128xf32>
    %c0_1 = arith.constant 0 : index
    %c0_2 = arith.constant 0 : index
    %1 = vector.load %arg2[%c0_1, %c0_2] : memref<32x16xf32, #tpu.memory_space<vmem>>, vector<32x16xf32>
    %cst = arith.constant dense<0.000000e+00> : vector<32x128xf32>
    %2 = tpu.matmul %1, %0, %cst {dimension_numbers = #tpu.dot_dimension_numbers<[1], [0], [0], [1], [0, 0, 1, 1], [], []>} : vector<32x16xf32>, vector<16x128xf32>, vector<32x128xf32> -> vector<32x128xf32>
    %c0_3 = arith.constant 0 : index
    %c0_4 = arith.constant 0 : index
    %3 = vector.load %arg3[%c0_3, %c0_4] : memref<32x1xf32, #tpu.memory_space<vmem>>, vector<32x1xf32>
    %4 = vector.broadcast %3 : vector<32x1xf32> to vector<32x128xf32>
    %5 = arith.addf %2, %4 : vector<32x128xf32>
    %cst_5 = arith.constant 0.000000e+00 : f32
    %6 = vector.broadcast %cst_5 : f32 to vector<32x128xf32>
    %7 = arith.maximumf %5, %6 : vector<32x128xf32>
    %c0_6 = arith.constant 0 : index
    %c0_7 = arith.constant 0 : index
    %8 = vector.load %arg4[%c0_6, %c0_7] : memref<16x32xf32, #tpu.memory_space<vmem>>, vector<16x32xf32>
    %cst_8 = arith.constant dense<0.000000e+00> : vector<16x128xf32>
    %9 = tpu.matmul %8, %7, %cst_8 {dimension_numbers = #tpu.dot_dimension_numbers<[1], [0], [0], [1], [0, 0, 1, 1], [], []>} : vector<16x32xf32>, vector<32x128xf32>, vector<16x128xf32> -> vector<16x128xf32>
    %10 = arith.addf %0, %9 : vector<16x128xf32>
    %c0_9 = arith.constant 0 : index
    %c0_10 = arith.constant 0 : index
    %11 = vector.load %arg5[%c0_9, %c0_10] : memref<16x1xf32, #tpu.memory_space<vmem>>, vector<16x1xf32>
    %12 = vector.broadcast %11 : vector<16x1xf32> to vector<16x128xf32>
    %13 = arith.addf %10, %12 : vector<16x128xf32>
    %cst_11 = arith.constant dense<0.000000e+00> : vector<128xf32>
    %14 = vector.multi_reduction <add>, %13, %cst_11 [0] : vector<16x128xf32> to vector<128xf32>
    %15 = vector.shape_cast %14 : vector<128xf32> to vector<1x128xf32>
    %cst_12 = arith.constant 6.250000e-02 : f32
    %16 = vector.broadcast %cst_12 : f32 to vector<1x128xf32>
    %17 = arith.mulf %15, %16 : vector<1x128xf32>
    %18 = arith.mulf %13, %13 : vector<16x128xf32>
    %cst_13 = arith.constant dense<0.000000e+00> : vector<128xf32>
    %19 = vector.multi_reduction <add>, %18, %cst_13 [0] : vector<16x128xf32> to vector<128xf32>
    %20 = vector.shape_cast %19 : vector<128xf32> to vector<1x128xf32>
    %cst_14 = arith.constant 6.250000e-02 : f32
    %21 = vector.broadcast %cst_14 : f32 to vector<1x128xf32>
    %22 = arith.mulf %20, %21 : vector<1x128xf32>
    %23 = arith.mulf %17, %17 : vector<1x128xf32>
    %24 = arith.subf %22, %23 : vector<1x128xf32>
    %25 = vector.broadcast %17 : vector<1x128xf32> to vector<16x128xf32>
    %26 = arith.subf %13, %25 : vector<16x128xf32>
    %cst_15 = arith.constant 9.99999974E-6 : f32
    %27 = vector.broadcast %cst_15 : f32 to vector<1x128xf32>
    %28 = arith.addf %24, %27 : vector<1x128xf32>
    %29 = math.rsqrt %28 : vector<1x128xf32>
    %30 = vector.broadcast %29 : vector<1x128xf32> to vector<16x128xf32>
    %31 = arith.mulf %26, %30 : vector<16x128xf32>
    %c0_16 = arith.constant 0 : index
    %c0_17 = arith.constant 0 : index
    %32 = vector.load %arg6[%c0_16, %c0_17] : memref<16x1xf32, #tpu.memory_space<vmem>>, vector<16x1xf32>
    %33 = vector.broadcast %32 : vector<16x1xf32> to vector<16x128xf32>
    %34 = arith.mulf %31, %33 : vector<16x128xf32>
    %c0_18 = arith.constant 0 : index
    %c0_19 = arith.constant 0 : index
    %35 = vector.load %arg7[%c0_18, %c0_19] : memref<16x1xf32, #tpu.memory_space<vmem>>, vector<16x1xf32>
    %36 = vector.broadcast %35 : vector<16x1xf32> to vector<16x128xf32>
    %37 = arith.addf %34, %36 : vector<16x128xf32>
    %c0_20 = arith.constant 0 : index
    %c0_21 = arith.constant 0 : index
    %38 = vector.load %arg8[%c0_20, %c0_21] : memref<16x128xf32, #tpu.memory_space<vmem>>, vector<16x128xf32>
    tpu.vector_store %arg8[%c0_20, %c0_21], %37 {strides = array<i32>} : memref<16x128xf32, #tpu.memory_space<vmem>>, vector<16x128xf32>,
    return
  }
  func.func @transform_0(%arg0: i32) -> (i32, i32) {
    %c0_i32 = arith.constant 0 : i32
    %c0_i32_0 = arith.constant 0 : i32
    return %c0_i32, %arg0 : i32, i32
  }
  func.func @transform_1(%arg0: i32) -> (i32, i32) {
    %c0_i32 = arith.constant 0 : i32
    %c0_i32_0 = arith.constant 0 : i32
    %c0_i32_1 = arith.constant 0 : i32
    return %c0_i32, %c0_i32_0 : i32, i32
  }
  func.func @transform_2(%arg0: i32) -> (i32, i32) {
    %c0_i32 = arith.constant 0 : i32
    %c0_i32_0 = arith.constant 0 : i32
    %c0_i32_1 = arith.constant 0 : i32
    return %c0_i32, %c0_i32_0 : i32, i32
  }
  func.func @transform_3(%arg0: i32) -> (i32, i32) {
    %c0_i32 = arith.constant 0 : i32
    %c0_i32_0 = arith.constant 0 : i32
    %c0_i32_1 = arith.constant 0 : i32
    return %c0_i32, %c0_i32_0 : i32, i32
  }
  func.func @transform_4(%arg0: i32) -> (i32, i32) {
    %c0_i32 = arith.constant 0 : i32
    %c0_i32_0 = arith.constant 0 : i32
    %c0_i32_1 = arith.constant 0 : i32
    return %c0_i32, %c0_i32_0 : i32, i32
  }
  func.func @transform_5(%arg0: i32) -> (i32, i32) {
    %c0_i32 = arith.constant 0 : i32
    %c0_i32_0 = arith.constant 0 : i32
    %c0_i32_1 = arith.constant 0 : i32
    return %c0_i32, %c0_i32_0 : i32, i32
  }
  func.func @transform_6(%arg0: i32) -> (i32, i32) {
    %c0_i32 = arith.constant 0 : i32
    %c0_i32_0 = arith.constant 0 : i32
    %c0_i32_1 = arith.constant 0 : i32
    return %c0_i32, %c0_i32_0 : i32, i32
  }
  func.func @transform_7(%arg0: i32) -> (i32, i32) {
    %c0_i32 = arith.constant 0 : i32
    %c0_i32_0 = arith.constant 0 : i32
    return %c0_i32, %arg0 : i32, i32
  }
}

</mosaic_0001>

<bundles_post_ra>
// kernel: tpu_custom_call.1
= control target key start
LH: loop header
LB: loop body
LE: loop exit
PB: predicated region body
PF: predicated region fallthrough
CT: control target
= control target key end

     0   :  { %vm57_vm0 = vcmask 130048   ;;  %v414_v4 = vmov 0   ;;  %s538_s0 = inlined_call_operand.vmem [shape: f32[16,128], index: 0, kind: input, shape index: {}]   ;;  %s539_s1 = inlined_call_operand.vmem [shape: f32[32,16], index: 1, kind: input, shape index: {}]   ;;  %s540_s2 = inlined_call_operand.vmem [shape: f32[32,1], index: 2, kind: input, shape index: {}]   ;;  %s541_s3 = inlined_call_operand.vmem [shape: f32[16,32], index: 3, kind: input, shape index: {}]   ;;  %s542_s4 = inlined_call_operand.vmem [shape: f32[16,1], index: 4, kind: input, shape index: {}]   ;;  %s543_s5 = inlined_call_operand.vmem [shape: f32[16,1], index: 5, kind: input, shape index: {}]   ;;  %s544_s6 = inlined_call_operand.vmem [shape: f32[16,1], index: 6, kind: input, shape index: {}]   ;;  %s545_s7 = inlined_call_operand.hbm [shape: f32[16,128], index: 7, kind: output, shape index: {}]  }
   0x1   :  { %v461_v0 = vld [vmem:[%s538_s0] sm:$0xff]  ;;  %v466_v1 = vld [vmem:[%s538_s0 + $0x8] sm:$0xff]  ;;  %386 = vset.pattern.permute.xlu0 %v414_v4  ;;  %387 = vset.pattern.permute.xlu1 %v414_v4  ;;  %v35_v6 = vld [vmem:[%s540_s2 + $0x10] sm:$0xff] }
   0x2   :  { %v29_v2 = vld [vmem:[%s539_s1] sm:$0xff]  ;;  %v370_v3 = vpack.c.bf16 %v466_v1, %v461_v0  ;;  %v30_v7 = vld [vmem:[%s539_s1 + $0x8] sm:$0xff]  ;;  %49 = vperm.xlu1 %387, %v35_v6   ;;  %v31_v9 = vld [vmem:[%s539_s1 + $0x10] sm:$0xff] }
   0x3   :  { %353 = vmatprep.mubr.msk.f32.mxu0 %vm57_vm0, %v29_v2  ;;  %v33_v5 = vld [vmem:[%s540_s2] sm:$0xff]  ;;  %v34_v8 = vld [vmem:[%s540_s2 + $0x8] sm:$0xff]  ;;  %v36_v10 = vld [vmem:[%s540_s2 + $0x18] sm:$0xff] }
   0x4   :  { %371 = vmatprep.subr.bf16.mxu0 %v370_v3  ;;  %39 = vperm.xlu0 %386, %v33_v5  }
   0x5   :  { %373 = vmatpush3.bf16.msra.mxu0 %v370_v3 }
   0x6   :  { %12 = vsyncpa [#allocation3], 0  ;;  %v32_v11 = vld [vmem:[%s539_s1 + $0x18] sm:$0xff]  ;;  %54 = vperm.xlu1 %387, %v36_v10   ;;  %v245_v12 = vld [vmem:[%s542_s4] sm:$0xff]  ;;  %vm161_vm1 = vcmask 261120  }
   0x7   :  { %v246_v13 = vld [vmem:[%s542_s4 + $0x8] sm:$0xff]  ;;  %v285_v14 = vld [vmem:[%s543_s5] sm:$0xff] }
   0x8   :  { %354 = vmatmul.mubr.msk.f32.vlgmr.msra.gmra.mrb[0].mxu0 %vm57_vm0, %v30_v7  ;;  %44 = vperm.xlu0 %386, %v34_v8   ;;  %v286_v15 = vld [vmem:[%s543_s5 + $0x8] sm:$0xff]  ;;  %v299_v16 = vld [vmem:[%s544_s6] sm:$0xff] }
   0x9   :  { %356 = vmatprep.mubr.msk.f32.mxu0 %vm57_vm0, %v31_v9  ;;  %v300_v17 = vld [vmem:[%s544_s6 + $0x8] sm:$0xff]  ;;  %v159_v18 = vld [vmem:[%s541_s3] sm:$0xff] }
   0xa   :  { %254 = vperm.xlu1 %387, %v246_v13   ;;  %367 = vmatprep.mubr.msk.f32.mxu1 %vm161_vm1, %v159_v18  ;;  %v160_v37 = vld [vmem:[%s541_s3 + $0x8] sm:$0xff]  ;;  %s415_s3 = smov [#allocation2]  }
   0xb   :  { %s320_s8 = sshll.u32 %s415_s3, 4  ;;  %s321_s8 = int_to_ptr.vmem [resolvable:$true] %s320_s8 }
   0xc   :  { %357 = vmatmul.mubr.msk.f32.gmra.mrb[2].mxu0 %vm57_vm0, %v32_v11  ;;  %249 = vperm.xlu0 %386, %v245_v12   ;;  %s390_s9 = scalar_lea.vmem %s321_s8, 256  ;;  %p395_p1 = scmp.lt.s32.totalorder %s321_s8, %s321_s8 }
   0xd   :  { %p391_p0 = scmp.ne.s32.totalorder %s321_s8, %s390_s9  ;;  %p396_p2 = scmp.lt.s32.totalorder %s390_s9, %s390_s9 }
   0xe   :  { %294 = vperm.xlu1 %387, %v286_v15  }
   0xf   :  { %p397_p3 = por %p396_p2, %p395_p1 }
  0x10   :  { %289 = vperm.xlu0 %386, %v285_v14  }
  0x11   :  { %p398_p4 = pnand %p397_p3, %p391_p0 }
  0x12   :  { %308 = vperm.xlu1 %387, %v300_v17  }
  0x14   :  { %303 = vperm.xlu0 %386, %v299_v16  }
  0x81   :  { %v50_v20 = vpop.permute.xlu1 %49 }
  0x83   :  { %v40_v19 = vpop.permute.xlu0 %39 }
  0x85   :  { %v55_v27 = vpop.permute.xlu1 %54 }
  0x87   :  { %v45_v21 = vpop.permute.xlu0 %44 }
  0x89   :  { %v255_v41 = vpop.permute.xlu1 %254 }
  0x8b   :  { %v250_v43 = vpop.permute.xlu0 %249 }
  0x8d   :  { %v295_v6 = vpop.permute.xlu1 %294 }
  0x8f   :  { %v290_v5 = vpop.permute.xlu0 %289 }
  0x91   :  { %v309_v13 = vpop.permute.xlu1 %308 }
  0x93   :  { %v304_v12 = vpop.permute.xlu0 %303 }
  0xdb   :  { %v355_v22 = vpop.f32.mrb[0].mxu0 }
  0xdc   :  { %v142_v23 = vadd.f32 %v355_v22, %v45_v21  ;;  %v136_v24 = vpop.f32.mrb[1].mxu0 }
  0xdd   :  { %v137_v25 = vadd.f32 %v136_v24, %v40_v19 }
  0xde   :  { %v156_v26 = vmax.f32 %v142_v23, 0.0 }
  0xdf   :  { %v155_v28 = vmax.f32 %v137_v25, 0.0  ;;  %v358_v29 = vpop.f32.mrb[2].mxu0 }
  0xe0   :  { %v152_v30 = vadd.f32 %v358_v29, %v55_v27  ;;  %v146_v31 = vpop.f32.mrb[3].mxu0 }
  0xe1   :  { %v147_v32 = vadd.f32 %v146_v31, %v50_v20  ;;  %v374_v33 = vpack.c.bf16 %v156_v26, %v155_v28 }
  0xe2   :  { %v158_v34 = vmax.f32 %v152_v30, 0.0 }
  0xe3   :  { %v157_v35 = vmax.f32 %v147_v32, 0.0  ;;  %375 = vmatprep.subr.bf16.mxu1 %v374_v33 }
  0xe4   :  { %377 = vmatpush3.bf16.msra.mxu1 %v374_v33 }
  0xe5   :  { %v378_v36 = vpack.c.bf16 %v158_v34, %v157_v35 }
  0xe7   :  { %379 = vmatprep.subr.bf16.mxu1 %v378_v36 }
  0xe8   :  { %381 = vmatpush3.bf16.msra.mxu1 %v378_v36 }
  0xeb   :  { %368 = vmatmul.mubr.msk.f32.vlgmr.msra.gmra.mrb[0].mxu1 %vm161_vm1, %v160_v37 }
 0x1be   :  { %v369_v38 = vpop.f32.mrb[0].mxu1 }
 0x1bf   :  { %v244_v39 = vadd.f32 %v369_v38, %v466_v1  ;;  %v234_v40 = vpop.f32.mrb[1].mxu1 }
 0x1c0   :  { %v243_v42 = vadd.f32 %v234_v40, %v461_v0 }
 0x1c1   :  { %v258_v44 = vadd.f32 %v255_v41, %v244_v39 }
 0x1c2   :  { %v257_v45 = vadd.f32 %v250_v43, %v243_v42 }
 0x1c3   :  { %v268_v46 = vmul.f32 %v258_v44, %v258_v44 }
 0x1c4   :  { %v259_v47 = vadd.f32 %v258_v44, %v257_v45  ;;  %v267_v48 = vmul.f32 %v257_v45, %v257_v45 }
 0x1c6   :  { %v260_v49 = vrot.slane %v259_v47, 4  ;;  %v269_v50 = vadd.f32 %v268_v46, %v267_v48 }
 0x1c8   :  { %v261_v51 = vadd.f32 %v260_v49, %v259_v47  ;;  %v270_v52 = vrot.slane %v269_v50, 4 }
 0x1ca   :  { %v262_v53 = vrot.slane %v261_v51, 2  ;;  %v271_v54 = vadd.f32 %v270_v52, %v269_v50 }
 0x1cc   :  { %v263_v55 = vadd.f32 %v262_v53, %v261_v51  ;;  %v272_v56 = vrot.slane %v271_v54, 2 }
 0x1ce   :  { %v264_v57 = vrot.slane %v263_v55, 1  ;;  %v273_v58 = vadd.f32 %v272_v56, %v271_v54 }
 0x1d0   :  { %v265_v59 = vadd.f32 %v264_v57, %v263_v55  ;;  %v274_v60 = vrot.slane %v273_v58, 1 }
 0x1d2   :  { %v266_v61 = vmul.f32 0.0625, %v265_v59  ;;  %v275_v62 = vadd.f32 %v274_v60, %v273_v58 }
 0x1d4   :  { %v276_v63 = vmul.f32 0.0625, %v275_v62  ;;  %v277_v0 = vmul.f32 %v266_v61, %v266_v61  ;;  %v279_v1 = vsub.f32 %v257_v45, %v266_v61  ;;  %v280_v2 = vsub.f32 %v258_v44, %v266_v61 }
 0x1d6   :  { %v278_v3 = vsub.f32 %v276_v63, %v277_v0 }
 0x1d8   :  { %v281_v4 = vadd.f32 1e-05, %v278_v3 }
 0x1da   :  { %388 = vrsqrt.f32 %v281_v4 }
 0x1e4   :  { %v389_v7 = vpop.eup %388 }
 0x1e5   :  { %v283_v8 = vmul.f32 %v389_v7, %v279_v1  ;;  %v284_v9 = vmul.f32 %v389_v7, %v280_v2 }
 0x1e7   :  { %v297_v10 = vmul.f32 %v290_v5, %v283_v8  ;;  %v298_v11 = vmul.f32 %v295_v6, %v284_v9 }
 0x1e9   :  { %v311_v14 = vadd.f32 %v304_v12, %v297_v10  ;;  %v312_v15 = vadd.f32 %v309_v13, %v298_v11 }
 0x1eb   :  { %313 = vst [vmem:[#allocation2] sm:$0xff] %v311_v14  ;;  %314 = vst [vmem:[#allocation2 + $0x8] sm:$0xff] %v312_v15 }
 0x1ec   :  { %401 = shalt.err (!%p398_p4)
}
 0x1ed   :  { %s402_s11 = scalar_lea.hbm %s545_s7, 256 }
 0x1ee   :  { %p403_p5 = scmp.ne.s32.totalorder %s545_s7, %s402_s11  ;;  %p406_p6 = scmp.lt.u32.totalorder %s402_s11, %s545_s7 }
 0x1f0   :  { %p408_p7 = pnand %p406_p6, %p403_p5 }
 0x1f2   :  { %411 = shalt.err (!%p408_p7)
}
 0x1f3   :  { %s416_s16 = smov 128   ;;  %s417_s17 = smov 8  }
 0x1f4   :  { %326 = dma.vmem_to_hbm [thread:$0]  %s321_s8, 256, %s545_s7, [#allocation3], %s416_s16, %s416_s16, %s417_s17  }
 0x1f5   :  { %412 = dma.done.wait [#allocation3], 256  }
 0x1f6   :  { %413 = vsyncadd [#allocation3], 4294967040 }
 0x1f7   :  { %330 = vsyncpa [#allocation3], 1 }

// kernel: tpu_custom_call.1
= control target key start
LH: loop header
LB: loop body
LE: loop exit
PB: predicated region body
PF: predicated region fallthrough
CT: control target
= control target key end

     0   :  { %vm57_vm0 = vcmask 130048   ;;  %v414_v4 = vmov 0   ;;  %s538_s0 = inlined_call_operand.vmem [shape: f32[16,128], index: 0, kind: input, shape index: {}]   ;;  %s539_s1 = inlined_call_operand.vmem [shape: f32[32,16], index: 1, kind: input, shape index: {}]   ;;  %s540_s2 = inlined_call_operand.vmem [shape: f32[32,1], index: 2, kind: input, shape index: {}]   ;;  %s541_s3 = inlined_call_operand.vmem [shape: f32[16,32], index: 3, kind: input, shape index: {}]   ;;  %s542_s4 = inlined_call_operand.vmem [shape: f32[16,1], index: 4, kind: input, shape index: {}]   ;;  %s543_s5 = inlined_call_operand.vmem [shape: f32[16,1], index: 5, kind: input, shape index: {}]   ;;  %s544_s6 = inlined_call_operand.vmem [shape: f32[16,1], index: 6, kind: input, shape index: {}]   ;;  %s545_s7 = inlined_call_operand.hbm [shape: f32[16,128], index: 7, kind: output, shape index: {}]  }
   0x1   :  { %v461_v0 = vld [vmem:[%s538_s0] sm:$0xff]  ;;  %v466_v1 = vld [vmem:[%s538_s0 + $0x8] sm:$0xff]  ;;  %386 = vset.pattern.permute.xlu0 %v414_v4  ;;  %387 = vset.pattern.permute.xlu1 %v414_v4  ;;  %v35_v6 = vld [vmem:[%s540_s2 + $0x10] sm:$0xff] }
   0x2   :  { %v29_v2 = vld [vmem:[%s539_s1] sm:$0xff]  ;;  %v370_v3 = vpack.c.bf16 %v466_v1, %v461_v0  ;;  %v30_v7 = vld [vmem:[%s539_s1 + $0x8] sm:$0xff]  ;;  %49 = vperm.xlu1 %387, %v35_v6   ;;  %v31_v9 = vld [vmem:[%s539_s1 + $0x10] sm:$0xff] }
   0x3   :  { %353 = vmatprep.mubr.msk.f32.mxu0 %vm57_vm0, %v29_v2  ;;  %v33_v5 = vld [vmem:[%s540_s2] sm:$0xff]  ;;  %v34_v8 = vld [vmem:[%s540_s2 + $0x8] sm:$0xff]  ;;  %v36_v10 = vld [vmem:[%s540_s2 + $0x18] sm:$0xff] }
   0x4   :  { %371 = vmatprep.subr.bf16.mxu0 %v370_v3  ;;  %39 = vperm.xlu0 %386, %v33_v5  }
   0x5   :  { %373 = vmatpush3.bf16.msra.mxu0 %v370_v3 }
   0x6   :  { %12 = vsyncpa [#allocation3], 0  ;;  %v32_v11 = vld [vmem:[%s539_s1 + $0x18] sm:$0xff]  ;;  %54 = vperm.xlu1 %387, %v36_v10   ;;  %v245_v12 = vld [vmem:[%s542_s4] sm:$0xff]  ;;  %vm161_vm1 = vcmask 261120  }
   0x7   :  { %v246_v13 = vld [vmem:[%s542_s4 + $0x8] sm:$0xff]  ;;  %v285_v14 = vld [vmem:[%s543_s5] sm:$0xff] }
   0x8   :  { %354 = vmatmul.mubr.msk.f32.vlgmr.msra.gmra.mrb[0].mxu0 %vm57_vm0, %v30_v7  ;;  %44 = vperm.xlu0 %386, %v34_v8   ;;  %v286_v15 = vld [vmem:[%s543_s5 + $0x8] sm:$0xff]  ;;  %v299_v16 = vld [vmem:[%s544_s6] sm:$0xff] }
   0x9   :  { %356 = vmatprep.mubr.msk.f32.mxu0 %vm57_vm0, %v31_v9  ;;  %v300_v17 = vld [vmem:[%s544_s6 + $0x8] sm:$0xff]  ;;  %v159_v18 = vld [vmem:[%s541_s3] sm:$0xff] }
   0xa   :  { %254 = vperm.xlu1 %387, %v246_v13   ;;  %367 = vmatprep.mubr.msk.f32.mxu1 %vm161_vm1, %v159_v18  ;;  %v160_v37 = vld [vmem:[%s541_s3 + $0x8] sm:$0xff]  ;;  %s415_s3 = smov [#allocation2]  }
   0xb   :  { %s320_s8 = sshll.u32 %s415_s3, 4  ;;  %s321_s8 = int_to_ptr.vmem [resolvable:$true] %s320_s8 }
   0xc   :  { %357 = vmatmul.mubr.msk.f32.gmra.mrb[2].mxu0 %vm57_vm0, %v32_v11  ;;  %249 = vperm.xlu0 %386, %v245_v12   ;;  %s390_s9 = scalar_lea.vmem %s321_s8, 256  ;;  %p395_p1 = scmp.lt.s32.totalorder %s321_s8, %s321_s8 }
   0xd   :  { %p391_p0 = scmp.ne.s32.totalorder %s321_s8, %s390_s9  ;;  %p396_p2 = scmp.lt.s32.totalorder %s390_s9, %s390_s9 }
   0xe   :  { %294 = vperm.xlu1 %387, %v286_v15  }
   0xf   :  { %p397_p3 = por %p396_p2, %p395_p1 }
  0x10   :  { %289 = vperm.xlu0 %386, %v285_v14  }
  0x11   :  { %p398_p4 = pnand %p397_p3, %p391_p0 }
  0x12   :  { %308 = vperm.xlu1 %387, %v300_v17  }
  0x14   :  { %303 = vperm.xlu0 %386, %v299_v16  }
  0x81   :  { %v50_v20 = vpop.permute.xlu1 %49 }
  0x83   :  { %v40_v19 = vpop.permute.xlu0 %39 }
  0x85   :  { %v55_v27 = vpop.permute.xlu1 %54 }
  0x87   :  { %v45_v21 = vpop.permute.xlu0 %44 }
  0x89   :  { %v255_v41 = vpop.permute.xlu1 %254 }
  0x8b   :  { %v250_v43 = vpop.permute.xlu0 %249 }
  0x8d   :  { %v295_v6 = vpop.permute.xlu1 %294 }
  0x8f   :  { %v290_v5 = vpop.permute.xlu0 %289 }
  0x91   :  { %v309_v13 = vpop.permute.xlu1 %308 }
  0x93   :  { %v304_v12 = vpop.permute.xlu0 %303 }
  0xdb   :  { %v355_v22 = vpop.f32.mrb[0].mxu0 }
  0xdc   :  { %v142_v23 = vadd.f32 %v355_v22, %v45_v21  ;;  %v136_v24 = vpop.f32.mrb[1].mxu0 }
  0xdd   :  { %v137_v25 = vadd.f32 %v136_v24, %v40_v19 }
  0xde   :  { %v156_v26 = vmax.f32 %v142_v23, 0.0 }
  0xdf   :  { %v155_v28 = vmax.f32 %v137_v25, 0.0  ;;  %v358_v29 = vpop.f32.mrb[2].mxu0 }
  0xe0   :  { %v152_v30 = vadd.f32 %v358_v29, %v55_v27  ;;  %v146_v31 = vpop.f32.mrb[3].mxu0 }
  0xe1   :  { %v147_v32 = vadd.f32 %v146_v31, %v50_v20  ;;  %v374_v33 = vpack.c.bf16 %v156_v26, %v155_v28 }
  0xe2   :  { %v158_v34 = vmax.f32 %v152_v30, 0.0 }
  0xe3   :  { %v157_v35 = vmax.f32 %v147_v32, 0.0  ;;  %375 = vmatprep.subr.bf16.mxu1 %v374_v33 }
  0xe4   :  { %377 = vmatpush3.bf16.msra.mxu1 %v374_v33 }
  0xe5   :  { %v378_v36 = vpack.c.bf16 %v158_v34, %v157_v35 }
  0xe7   :  { %379 = vmatprep.subr.bf16.mxu1 %v378_v36 }
  0xe8   :  { %381 = vmatpush3.bf16.msra.mxu1 %v378_v36 }
  0xeb   :  { %368 = vmatmul.mubr.msk.f32.vlgmr.msra.gmra.mrb[0].mxu1 %vm161_vm1, %v160_v37 }
 0x1be   :  { %v369_v38 = vpop.f32.mrb[0].mxu1 }
 0x1bf   :  { %v244_v39 = vadd.f32 %v369_v38, %v466_v1  ;;  %v234_v40 = vpop.f32.mrb[1].mxu1 }
 0x1c0   :  { %v243_v42 = vadd.f32 %v234_v40, %v461_v0 }
 0x1c1   :  { %v258_v44 = vadd.f32 %v255_v41, %v244_v39 }
 0x1c2   :  { %v257_v45 = vadd.f32 %v250_v43, %v243_v42 }
 0x1c3   :  { %v268_v46 = vmul.f32 %v258_v44, %v258_v44 }
 0x1c4   :  { %v259_v47 = vadd.f32 %v258_v44, %v257_v45  ;;  %v267_v48 = vmul.f32 %v257_v45, %v257_v45 }
 0x1c6   :  { %v260_v49 = vrot.slane %v259_v47, 4  ;;  %v269_v50 = vadd.f32 %v268_v46, %v267_v48 }
 0x1c8   :  { %v261_v51 = vadd.f32 %v260_v49, %v259_v47  ;;  %v270_v52 = vrot.slane %v269_v50, 4 }
 0x1ca   :  { %v262_v53 = vrot.slane %v261_v51, 2  ;;  %v271_v54 = vadd.f32 %v270_v52, %v269_v50 }
 0x1cc   :  { %v263_v55 = vadd.f32 %v262_v53, %v261_v51  ;;  %v272_v56 = vrot.slane %v271_v54, 2 }
 0x1ce   :  { %v264_v57 = vrot.slane %v263_v55, 1  ;;  %v273_v58 = vadd.f32 %v272_v56, %v271_v54 }
 0x1d0   :  { %v265_v59 = vadd.f32 %v264_v57, %v263_v55  ;;  %v274_v60 = vrot.slane %v273_v58, 1 }
 0x1d2   :  { %v266_v61 = vmul.f32 0.0625, %v265_v59  ;;  %v275_v62 = vadd.f32 %v274_v60, %v273_v58 }
 0x1d4   :  { %v276_v63 = vmul.f32 0.0625, %v275_v62  ;;  %v277_v0 = vmul.f32 %v266_v61, %v266_v61  ;;  %v279_v1 = vsub.f32 %v257_v45, %v266_v61  ;;  %v280_v2 = vsub.f32 %v258_v44, %v266_v61 }
 0x1d6   :  { %v278_v3 = vsub.f32 %v276_v63, %v277_v0 }
 0x1d8   :  { %v281_v4 = vadd.f32 1e-05, %v278_v3 }
 0x1da   :  { %388 = vrsqrt.f32 %v281_v4 }
 0x1e4   :  { %v389_v7 = vpop.eup %388 }
 0x1e5   :  { %v283_v8 = vmul.f32 %v389_v7, %v279_v1  ;;  %v284_v9 = vmul.f32 %v389_v7, %v280_v2 }
 0x1e7   :  { %v297_v10 = vmul.f32 %v290_v5, %v283_v8  ;;  %v298_v11 = vmul.f32 %v295_v6, %v284_v9 }
 0x1e9   :  { %v311_v14 = vadd.f32 %v304_v12, %v297_v10  ;;  %v312_v15 = vadd.f32 %v309_v13, %v298_v11 }
 0x1eb   :  { %313 = vst [vmem:[#allocation2] sm:$0xff] %v311_v14  ;;  %314 = vst [vmem:[#allocation2 + $0x8] sm:$0xff] %v312_v15 }
 0x1ec   :  { %401 = shalt.err (!%p398_p4)
}
 0x1ed   :  { %s402_s11 = scalar_lea.hbm %s545_s7, 256 }
 0x1ee   :  { %p403_p5 = scmp.ne.s32.totalorder %s545_s7, %s402_s11  ;;  %p406_p6 = scmp.lt.u32.totalorder %s402_s11, %s545_s7 }
 0x1f0   :  { %p408_p7 = pnand %p406_p6, %p403_p5 }
 0x1f2   :  { %411 = shalt.err (!%p408_p7)
}
 0x1f3   :  { %s416_s16 = smov 128   ;;  %s417_s17 = smov 8  }
 0x1f4   :  { %326 = dma.vmem_to_hbm [thread:$0]  %s321_s8, 256, %s545_s7, [#allocation3], %s416_s16, %s416_s16, %s417_s17  }
 0x1f5   :  { %412 = dma.done.wait [#allocation3], 256  }
 0x1f6   :  { %413 = vsyncadd [#allocation3], 4294967040 }
 0x1f7   :  { %330 = vsyncpa [#allocation3], 1 }

</bundles_post_ra>
